<compile_context>
chip_gen: v5e
topology: v5e:2x2
jax: 0.10.0
libtpu: 0.0.40
codegen_flags: <defaults>
</compile_context>

<pallas_src>
import functools

import jax
import jax.numpy as jnp
from jax.experimental import pallas as pl
from jax.experimental.pallas import tpu as pltpu


def _round_up(a: int, b: int) -> int:
    return (a + b - 1) // b * b


def _tpu_defaults():
    """Per-generation (tm, vmem_limit_bytes) defaults."""
    kind = ""
    try:
        kind = jax.devices()[0].device_kind.lower()
    except Exception:
        pass
    if "v7" in kind:
        # v7x: 64 MiB VMEM per TensorCore -> stay under ~48 MiB, keep many
        # tiles so both TCs get work via the "parallel" grid axis.
        return 512, 48 * 1024 * 1024
    # v5e / v6e: 128 MiB physical VMEM -> bigger node tiles, higher limit.
    return 1024, 96 * 1024 * 1024


def _pick_tile(n, dim_in, dp, num_graphs, tm, x_bytes, out_bytes, vmem_limit):
    """Node-tile size: as large as requested, clamped by a VMEM estimate."""
    tm = max(8, _round_up(tm, 8))
    if n <= tm:
        return n  # single block covering the whole node axis (always legal)

    def vmem_estimate(t):
        # Double-buffered x / out / batch tiles + (double-buffered) residents.
        tiles = 2 * t * (dim_in * x_bytes + dp * out_bytes + 4)
        resident = 2 * (dim_in * dp * x_bytes + (num_graphs * 2 + 1) * dp * 4)
        return tiles + resident

    while tm > 64 and vmem_estimate(tm) > int(0.75 * vmem_limit):
        tm = _round_up(max(64, tm // 2), 8)
    return tm


def hyper_kernel(ctx_ref, w_gate_ref, b_gate_ref, w_hbias_ref, tbl_ref):
    """Run the hyper-networks once: tbl = [sigmoid(ctx@Wg+bg) | ctx@Wb].

    Each half is already padded to Dp (multiple of 128) lanes, so the concat
    boundary is 128-aligned.
    """
    ctx = ctx_ref[...]                                                 # (B, Dc)
    gate_tbl = jax.nn.sigmoid(
        jnp.dot(ctx, w_gate_ref[...], preferred_element_type=jnp.float32)
        + b_gate_ref[...])                                             # (B, Dp)
    bias_tbl = jnp.dot(ctx, w_hbias_ref[...],
                       preferred_element_type=jnp.float32)             # (B, Dp)
    tbl_ref[...] = jnp.concatenate([gate_tbl, bias_tbl],
                                   axis=-1).astype(tbl_ref.dtype)      # (B, 2*Dp)


def glu_kernel(x_ref, batch_ref, tbl_ref, w_layer_ref, b_layer_ref, o_ref):
    """One node tile: o = (x @ Wl + bl) * gate[batch] + bias[batch]."""
    tm = x_ref.shape[0]
    num_graphs = tbl_ref.shape[0]
    dp = o_ref.shape[1]  # dim_out padded to a multiple of 128

    # Main linear layer on the node tile (MXU), f32 accumulation.
    y = jnp.dot(x_ref[...], w_layer_ref[...],
                preferred_element_type=jnp.float32) + b_layer_ref[...]  # (tm, Dp)

    # Gather gate[batch] / bias[batch] with a SINGLE one-hot matmul against
    # the fused (B, 2*Dp) table (exact in f32, stays on the MXU).
    # TODO(synk): switch to scalar-prefetched tbl indexing for large B.
    b_idx = batch_ref[...]                                              # (tm, 1)
    iota = jax.lax.broadcasted_iota(jnp.int32, (tm, num_graphs), 1)     # (tm, B)
    onehot = (b_idx == iota).astype(jnp.float32)                        # (tm, B)
    gb = jnp.dot(onehot, tbl_ref[...],
                 preferred_element_type=jnp.float32)                    # (tm, 2*Dp)
    gate_n = gb[:, :dp]   # 128-aligned split: no intra-vreg relayout
    bias_n = gb[:, dp:]

    o_ref[...] = (y * gate_n + bias_n).astype(o_ref.dtype)


@functools.partial(jax.jit,
                   static_argnames=("tm", "vmem_limit_bytes", "mxu_dtype"))
def _glu_forward_impl(x, batch, ctx, w_layer, b_layer, w_gate, b_gate, w_hbias,
                      *, tm, vmem_limit_bytes, mxu_dtype):
    n, dim_in = x.shape
    num_graphs, _ = ctx.shape
    dim_out = w_layer.shape[1]
    out_dtype = x.dtype

    if n == 0:
        return jnp.zeros((0, dim_out), out_dtype)

    # ---- Lane-dense padding of the (tiny) feature-side parameters -----------
    dp = _round_up(dim_out, 128)
    pad_c = dp - dim_out
    w_layer_p = jnp.pad(w_layer, ((0, 0), (0, pad_c))).astype(mxu_dtype)
    b_layer_p = jnp.pad(b_layer.reshape(1, dim_out), ((0, 0), (0, pad_c)))
    w_gate_p = jnp.pad(w_gate, ((0, 0), (0, pad_c)))
    b_gate_p = jnp.pad(b_gate.reshape(1, dim_out), ((0, 0), (0, pad_c)))
    w_hbias_p = jnp.pad(w_hbias, ((0, 0), (0, pad_c)))

    # ---- Stage 1: hyper networks, computed once (single kernel invocation) --
    # TODO(synk): tile this (or move to plain XLA) if B * 2*Dp outgrows VMEM.
    tbl = pl.pallas_call(
        hyper_kernel,
        out_shape=jax.ShapeDtypeStruct((num_graphs, 2 * dp), jnp.float32),
    )(ctx.astype(jnp.float32), w_gate_p, b_gate_p, w_hbias_p)

    # ---- Stage 2: node-tiled main kernel (no padding / slicing along N) -----
    x_k = x.astype(mxu_dtype)
    batch_k = batch.reshape(n, 1).astype(jnp.int32)

    tm_eff = _pick_tile(n, dim_in, dp, num_graphs, tm,
                        jnp.dtype(mxu_dtype).itemsize,
                        jnp.dtype(out_dtype).itemsize,
                        vmem_limit_bytes)
    grid = (pl.cdiv(n, tm_eff),)

    out = pl.pallas_call(
        glu_kernel,
        out_shape=jax.ShapeDtypeStruct((n, dp), out_dtype),
        grid_spec=pltpu.PrefetchScalarGridSpec(
            num_scalar_prefetch=0,
            grid=grid,
            in_specs=[
                pl.BlockSpec((tm_eff, dim_in), lambda i: (i, 0)),          # x tile
                pl.BlockSpec((tm_eff, 1), lambda i: (i, 0)),               # batch tile
                pl.BlockSpec((num_graphs, 2 * dp), lambda i: (0, 0)),      # gate|bias tbl
                pl.BlockSpec((dim_in, dp), lambda i: (0, 0)),              # W_layer (resident)
                pl.BlockSpec((1, dp), lambda i: (0, 0)),                   # b_layer (resident)
            ],
            out_specs=pl.BlockSpec((tm_eff, dp), lambda i: (i, 0)),
        ),
        compiler_params=pltpu.CompilerParams(
            dimension_semantics=("parallel",),
            vmem_limit_bytes=vmem_limit_bytes,
        ),
    )(x_k, batch_k, tbl, w_layer_p, b_layer_p)

    if dp != dim_out:
        out = out[:, :dim_out]  # small; make dim_out a 128-multiple to avoid
    return out


def glu_forward(x, batch, ctx, w_layer, b_layer, w_gate, b_gate, w_hbias, *,
                tm=None, vmem_limit_bytes=None, mxu_dtype=None):
    tm_def, vmem_def = _tpu_defaults()
    tm = tm_def if tm is None else tm
    vmem_limit_bytes = vmem_def if vmem_limit_bytes is None else vmem_limit_bytes
    # mxu_dtype=jnp.bfloat16 halves HBM/DMA bytes on v6e/v7x (f32 accum kept);
    # default f32 keeps the exactness check below tight.
    mxu_dtype = jnp.float32 if mxu_dtype is None else mxu_dtype
    return _glu_forward_impl(x, batch, ctx, w_layer, b_layer, w_gate, b_gate,
                             w_hbias, tm=tm, vmem_limit_bytes=vmem_limit_bytes,
                             mxu_dtype=mxu_dtype)


def reference_glu(x, batch, ctx, w_layer, b_layer, w_gate, b_gate, w_hbias):
    gate = jax.nn.sigmoid(ctx @ w_gate + b_gate)
    bias = ctx @ w_hbias
    y = x @ w_layer + b_layer
    return y * gate[batch] + bias[batch]


if __name__ == "__main__":
    # Small synthetic shapes consistent with the module's forward.
    N, DIM_IN, DIM_OUT, DIM_CTX, NUM_GRAPHS = 64, 16, 32, 8, 4

    key = jax.random.PRNGKey(0)
    kx, kc, kb, k1, k2, k3, k4, k5 = jax.random.split(key, 8)

    x = jax.random.normal(kx, (N, DIM_IN), dtype=jnp.float32)
    ctx = jax.random.normal(kc, (NUM_GRAPHS, DIM_CTX), dtype=jnp.float32)
    batch = jax.random.randint(kb, (N,), 0, NUM_GRAPHS, dtype=jnp.int32)

    # Deterministic parameter init (PyTorch Linear shapes, stored as [in, out]).
    w_layer = jax.random.normal(k1, (DIM_IN, DIM_OUT), dtype=jnp.float32) * 0.1
    b_layer = jax.random.normal(k2, (DIM_OUT,), dtype=jnp.float32) * 0.1
    w_gate = jax.random.normal(k3, (DIM_CTX, DIM_OUT), dtype=jnp.float32) * 0.1
    b_gate = jax.random.normal(k4, (DIM_OUT,), dtype=jnp.float32) * 0.1
    w_hbias = jax.random.normal(k5, (DIM_CTX, DIM_OUT), dtype=jnp.float32) * 0.1

    out = glu_forward(x, batch, ctx, w_layer, b_layer, w_gate, b_gate, w_hbias)
    out = jax.block_until_ready(out)

    ref = reference_glu(x, batch, ctx, w_layer, b_layer, w_gate, b_gate, w_hbias)
    assert out.shape == (N, DIM_OUT)
    assert jnp.allclose(out, ref, atol=1e-5, rtol=1e-5)

    print("KERNEL_OK")
</pallas_src>

<mosaic_0001>
module attributes {stable_mosaic.version = 11 : i64} {
  func.func @hyper_kernel(%arg0: memref<4x8xf32, #tpu.memory_space<vmem>>, %arg1: memref<8x128xf32, #tpu.memory_space<vmem>>, %arg2: memref<1x128xf32, #tpu.memory_space<vmem>>, %arg3: memref<8x128xf32, #tpu.memory_space<vmem>>, %arg4: memref<4x256xf32, #tpu.memory_space<vmem>>) attributes {dimension_semantics = [], scalar_prefetch = 0 : i64, scratch_operands = 0 : i64, tpu.core_type = #tpu.core_type<tc>} {
    %c0 = arith.constant 0 : index
    %c0_0 = arith.constant 0 : index
    %0 = vector.load %arg0[%c0, %c0_0] : memref<4x8xf32, #tpu.memory_space<vmem>>, vector<4x8xf32>
    %c0_1 = arith.constant 0 : index
    %c0_2 = arith.constant 0 : index
    %1 = vector.load %arg1[%c0_1, %c0_2] : memref<8x128xf32, #tpu.memory_space<vmem>>, vector<8x128xf32>
    %cst = arith.constant dense<0.000000e+00> : vector<4x128xf32>
    %2 = tpu.matmul %0, %1, %cst {dimension_numbers = #tpu.dot_dimension_numbers<[1], [0], [0], [1], [0, 0, 1, 1], [], []>} : vector<4x8xf32>, vector<8x128xf32>, vector<4x128xf32> -> vector<4x128xf32>
    %c0_3 = arith.constant 0 : index
    %c0_4 = arith.constant 0 : index
    %3 = vector.load %arg2[%c0_3, %c0_4] : memref<1x128xf32, #tpu.memory_space<vmem>>, vector<1x128xf32>
    %4 = vector.broadcast %3 : vector<1x128xf32> to vector<4x128xf32>
    %5 = arith.addf %2, %4 : vector<4x128xf32>
    %6 = arith.negf %5 : vector<4x128xf32>
    %7 = math.exp %6 : vector<4x128xf32>
    %cst_5 = arith.constant 1.000000e+00 : f32
    %8 = vector.broadcast %cst_5 : f32 to vector<4x128xf32>
    %9 = arith.addf %8, %7 : vector<4x128xf32>
    %10 = arith.divf %8, %9 : vector<4x128xf32>
    %c0_6 = arith.constant 0 : index
    %c0_7 = arith.constant 0 : index
    %11 = vector.load %arg3[%c0_6, %c0_7] : memref<8x128xf32, #tpu.memory_space<vmem>>, vector<8x128xf32>
    %cst_8 = arith.constant dense<0.000000e+00> : vector<4x128xf32>
    %12 = tpu.matmul %0, %11, %cst_8 {dimension_numbers = #tpu.dot_dimension_numbers<[1], [0], [0], [1], [0, 0, 1, 1], [], []>} : vector<4x8xf32>, vector<8x128xf32>, vector<4x128xf32> -> vector<4x128xf32>
    %13 = tpu.concatenate %10, %12 in 1 : vector<4x128xf32>, vector<4x128xf32> -> vector<4x256xf32>
    %c0_9 = arith.constant 0 : index
    %c0_10 = arith.constant 0 : index
    %14 = vector.load %arg4[%c0_9, %c0_10] : memref<4x256xf32, #tpu.memory_space<vmem>>, vector<4x256xf32>
    tpu.vector_store %arg4[%c0_9, %c0_10], %13 {strides = array<i32>} : memref<4x256xf32, #tpu.memory_space<vmem>>, vector<4x256xf32>,
    return
  }
}

module attributes {stable_mosaic.version = 11 : i64} {
  func.func @glu_kernel(%arg0: i32, %arg1: memref<64x16xf32, #tpu.memory_space<vmem>>, %arg2: memref<64x1xi32, #tpu.memory_space<vmem>>, %arg3: memref<4x256xf32, #tpu.memory_space<vmem>>, %arg4: memref<16x128xf32, #tpu.memory_space<vmem>>, %arg5: memref<1x128xf32, #tpu.memory_space<vmem>>, %arg6: memref<64x128xf32, #tpu.memory_space<vmem>>) attributes {dimension_semantics = [#tpu.dimension_semantics<parallel>], iteration_bounds = array<i64: 1>, scalar_prefetch = 0 : i64, scratch_operands = 0 : i64, tpu.core_type = #tpu.core_type<tc>, window_params = [{transform_indices = @transform_0, window_bounds = array<i64: 64, 16>}, {transform_indices = @transform_1, window_bounds = array<i64: 64, 1>}, {pipeline_mode = #tpu.pipeline_mode<synchronous>, transform_indices = @transform_2, window_bounds = array<i64: 4, 256>}, {pipeline_mode = #tpu.pipeline_mode<synchronous>, transform_indices = @transform_3, window_bounds = array<i64: 16, 128>}, {pipeline_mode = #tpu.pipeline_mode<synchronous>, transform_indices = @transform_4, window_bounds = array<i64: 1, 128>}, {transform_indices = @transform_5, window_bounds = array<i64: 64, 128>}]} {
    %c0 = arith.constant 0 : index
    %c0_0 = arith.constant 0 : index
    %0 = vector.load %arg1[%c0, %c0_0] : memref<64x16xf32, #tpu.memory_space<vmem>>, vector<64x16xf32>
    %c0_1 = arith.constant 0 : index
    %c0_2 = arith.constant 0 : index
    %1 = vector.load %arg4[%c0_1, %c0_2] : memref<16x128xf32, #tpu.memory_space<vmem>>, vector<16x128xf32>
    %cst = arith.constant dense<0.000000e+00> : vector<64x128xf32>
    %2 = tpu.matmul %0, %1, %cst {dimension_numbers = #tpu.dot_dimension_numbers<[1], [0], [0], [1], [0, 0, 1, 1], [], []>} : vector<64x16xf32>, vector<16x128xf32>, vector<64x128xf32> -> vector<64x128xf32>
    %c0_3 = arith.constant 0 : index
    %c0_4 = arith.constant 0 : index
    %3 = vector.load %arg5[%c0_3, %c0_4] : memref<1x128xf32, #tpu.memory_space<vmem>>, vector<1x128xf32>
    %4 = vector.broadcast %3 : vector<1x128xf32> to vector<64x128xf32>
    %5 = arith.addf %2, %4 : vector<64x128xf32>
    %c0_5 = arith.constant 0 : index
    %c0_6 = arith.constant 0 : index
    %6 = vector.load %arg2[%c0_5, %c0_6] : memref<64x1xi32, #tpu.memory_space<vmem>>, vector<64x1xi32>
    %7 = tpu.iota {dimensions = array<i32: 1>} : vector<64x4xi32>
    %8 = vector.broadcast %6 : vector<64x1xi32> to vector<64x4xi32>
    %9 = arith.cmpi eq, %8, %7 : vector<64x4xi32>
    %10 = arith.extui %9 : vector<64x4xi1> to vector<64x4xi32>
    %11 = arith.sitofp %10 : vector<64x4xi32> to vector<64x4xf32>
    %c0_7 = arith.constant 0 : index
    %c0_8 = arith.constant 0 : index
    %12 = vector.load %arg3[%c0_7, %c0_8] : memref<4x256xf32, #tpu.memory_space<vmem>>, vector<4x256xf32>
    %cst_9 = arith.constant dense<0.000000e+00> : vector<64x256xf32>
    %13 = tpu.matmul %11, %12, %cst_9 {dimension_numbers = #tpu.dot_dimension_numbers<[1], [0], [0], [1], [0, 0, 1, 1], [], []>} : vector<64x4xf32>, vector<4x256xf32>, vector<64x256xf32> -> vector<64x256xf32>
    %14 = vector.extract_strided_slice %13 {offsets = [0, 0], sizes = [64, 128], strides = [1, 1]} : vector<64x256xf32> to vector<64x128xf32>
    %15 = vector.extract_strided_slice %13 {offsets = [0, 128], sizes = [64, 128], strides = [1, 1]} : vector<64x256xf32> to vector<64x128xf32>
    %16 = arith.mulf %5, %14 : vector<64x128xf32>
    %17 = arith.addf %16, %15 : vector<64x128xf32>
    %c0_10 = arith.constant 0 : index
    %c0_11 = arith.constant 0 : index
    %18 = vector.load %arg6[%c0_10, %c0_11] : memref<64x128xf32, #tpu.memory_space<vmem>>, vector<64x128xf32>
    tpu.vector_store %arg6[%c0_10, %c0_11], %17 {strides = array<i32>} : memref<64x128xf32, #tpu.memory_space<vmem>>, vector<64x128xf32>,
    return
  }
  func.func @transform_0(%arg0: i32) -> (i32, i32) {
    %c0_i32 = arith.constant 0 : i32
    %c0_i32_0 = arith.constant 0 : i32
    return %arg0, %c0_i32 : i32, i32
  }
  func.func @transform_1(%arg0: i32) -> (i32, i32) {
    %c0_i32 = arith.constant 0 : i32
    %c0_i32_0 = arith.constant 0 : i32
    return %arg0, %c0_i32 : i32, i32
  }
  func.func @transform_2(%arg0: i32) -> (i32, i32) {
    %c0_i32 = arith.constant 0 : i32
    %c0_i32_0 = arith.constant 0 : i32
    %c0_i32_1 = arith.constant 0 : i32
    return %c0_i32, %c0_i32_0 : i32, i32
  }
  func.func @transform_3(%arg0: i32) -> (i32, i32) {
    %c0_i32 = arith.constant 0 : i32
    %c0_i32_0 = arith.constant 0 : i32
    %c0_i32_1 = arith.constant 0 : i32
    return %c0_i32, %c0_i32_0 : i32, i32
  }
  func.func @transform_4(%arg0: i32) -> (i32, i32) {
    %c0_i32 = arith.constant 0 : i32
    %c0_i32_0 = arith.constant 0 : i32
    %c0_i32_1 = arith.constant 0 : i32
    return %c0_i32, %c0_i32_0 : i32, i32
  }
  func.func @transform_5(%arg0: i32) -> (i32, i32) {
    %c0_i32 = arith.constant 0 : i32
    %c0_i32_0 = arith.constant 0 : i32
    return %arg0, %c0_i32 : i32, i32
  }
}

</mosaic_0001>

<bundles_post_ra>
// kernel: _glu_forward_impl.2
= control target key start
LH: loop header
LB: loop body
LE: loop exit
PB: predicated region body
PF: predicated region fallthrough
CT: control target
= control target key end

     0   :  { %vm23_vm0 = vcmask 64512   ;;  %vm90_vm4 = vcmask 1043456   ;;  %s146_s1 = inlined_call_operand.vmem [shape: f32[8,128], index: 1, kind: input, shape index: {}]   ;;  %s147_s0 = inlined_call_operand.vmem [shape: f32[4,8], index: 0, kind: input, shape index: {}]   ;;  %s148_s3 = inlined_call_operand.vmem [shape: f32[8,128], index: 3, kind: input, shape index: {}]   ;;  %s149_s2 = inlined_call_operand.vmem [shape: f32[1,128], index: 2, kind: input, shape index: {}]   ;;  %s150_s4 = inlined_call_operand.vmem [shape: f32[4,256], index: 4, kind: output, shape index: {}]  }
   0x1   :  { %v18_v0 = vld [vmem:[%s146_s1] sm:$0xff] }
   0x2   :  { %v17_v1 = vld [vmem:[%s147_s0] sm:$0xf]  ;;  %42 = vmatpush.msra.mxu0 %v18_v0 }
   0x3   :  { %v66_v2 = vld [vmem:[%s148_s3] sm:$0xff]  ;;  %98 = vmatmul.msk.f32.vlgmr.msra.gmra.mxu0 %vm23_vm0, %v17_v1 }
   0x4   :  { %82 = vmatpush.msra.mxu1 %v66_v2  ;;  %v101_v3 = vld [vmem:[%s149_s2] ss:$0 sm:$0xff] }
   0x5   :  { %100 = vmatmul.msk.f32.vlgmr.msra.gmra.mxu1 %vm23_vm0, %v17_v1 }
  0x80   :  { %v44_v4 = vpop.f32.mrf.mxu0 }
  0x81   :  { %v45_v5 = vadd.f32 %v101_v3, %v44_v4 }
  0x82   :  { %v84_v13 = vpop.f32.mrf.mxu1 }
  0x83   :  { %v99_v6 = vmul.f32 -1.442695, %v45_v5  ;;  %v89_v17 = vrot.slane %v84_v13, 4 }
  0x85   :  { %102 = vpow2.f32 %v99_v6 }
  0x8b   :  { %v103_v7 = vpop.eup %102 }
  0x8c   :  { %v50_v8 = vadd.f32 1.0, %v103_v7 }
  0x8e   :  { %104 = vrcp.f32 %v50_v8  ;;  %v62_v12 = vand.u32 2147483648, %v50_v8  ;;  %v60_v15 = vand.u32 2147483647, %v50_v8  ;;  %vm56_vm2 = vweird.f32 %v50_v8 }
  0x90   :  { %v63_v18 = vor.u32 1.1754944e-38, %v62_v12  ;;  %vm61_vm5 = vcmp.eq.f32.partialorder %v60_v15, 8.507059e+37 }
  0x94   :  { %v105_v9 = vpop.eup %104 }
  0x95   :  { %v52_v10 = vmul.f32 %v105_v9, %v50_v8  ;;  %vm57_vm1 = vweird.f32 %v105_v9 }
  0x96   :  { %vm58_vm3 = vmor %vm56_vm2, %vm57_vm1 }
  0x97   :  { %v53_v11 = vsub.f32 1.0, %v52_v10 }
  0x99   :  { %v54_v14 = vmul.f32 %v105_v9, %v53_v11 }
  0x9b   :  { %v55_v16 = vadd.f32 %v105_v9, %v54_v14 }
  0x9d   :  { %v59_v19 = vsel %vm58_vm3, %v105_v9, %v55_v16 }
  0x9e   :  { %v64_v20 = vsel %vm61_vm5, %v63_v18, %v59_v19 }
  0x9f   :  { %v91_v21 = vsel %vm90_vm4, %v64_v20, %v89_v17 }
  0xa0   :  { %93 = vst [vmem:[%s150_s4] sm:$0xff] %v91_v21 }

// kernel: _glu_forward_impl.3
= control target key start
LH: loop header
LB: loop body
LE: loop exit
PB: predicated region body
PF: predicated region fallthrough
CT: control target
= control target key end

     0   :  { %v347_v0 = vmov 0   ;;  %vm34_vm0 = vcmask 130048   ;;  %vm188_vm1 = vcmask 1043456   ;;  %v108_v20 = vlaneseq  ;;  %s487_s1 = inlined_call_operand.vmem [shape: s32[64,1], index: 1, kind: input, shape index: {}]   ;;  %s488_s3 = inlined_call_operand.vmem [shape: f32[16,128], index: 3, kind: input, shape index: {}]   ;;  %s489_s4 = inlined_call_operand.vmem [shape: f32[1,128], index: 4, kind: input, shape index: {}]   ;;  %s490_s2 = inlined_call_operand.vmem [shape: f32[4,256], index: 2, kind: input, shape index: {}]   ;;  %s491_s0 = inlined_call_operand.vmem [shape: f32[64,16], index: 0, kind: input, shape index: {}]   ;;  %s492_s5 = inlined_call_operand.vmem [shape: f32[64,128], index: 5, kind: output, shape index: {}]  }
   0x1   :  { %344 = vset.pattern.permute.xlu1 %v347_v0  ;;  %343 = vset.pattern.permute.xlu0 %v347_v0  ;;  %v102_v1 = vld [vmem:[%s487_s1 + $0x10] sm:$0xff]  ;;  %v100_v2 = vld [vmem:[%s487_s1] sm:$0xff]  ;;  %v29_v4 = vld [vmem:[%s488_s3 + $0x8] sm:$0xff]  ;;  %vm163_vm2 = vcmask 31744   ;;  %v348_v24 = vmov 0.0  }
   0x2   :  { %117 = vperm.xlu1 %344, %v102_v1   ;;  %111 = vperm.xlu0 %343, %v100_v2   ;;  %v104_v3 = vld [vmem:[%s487_s1 + $0x20] sm:$0xff]  ;;  %v103_v6 = vld [vmem:[%s487_s1 + $0x18] sm:$0xff]  ;;  %v101_v7 = vld [vmem:[%s487_s1 + $0x8] sm:$0xff]  ;;  %v109_v21 = vand.u32 127, %v108_v20 }
   0x3   :  { %345 = vset.pattern.permute.xlu2 %v347_v0  ;;  %73 = vmatpush.msra.mxu0 %v29_v4  ;;  %v28_v5 = vld [vmem:[%s488_s3] sm:$0xff]  ;;  %v105_v8 = vld [vmem:[%s487_s1 + $0x28] sm:$0xff]  ;;  %v106_v9 = vld [vmem:[%s487_s1 + $0x30] sm:$0xff] }
   0x4   :  { %123 = vperm.xlu2 %345, %v104_v3   ;;  %337 = vmatpush.msra.mxu3 %v29_v4  ;;  %v107_v10 = vld [vmem:[%s487_s1 + $0x38] sm:$0xff]  ;;  %v158_v11 = vld [vmem:[%s490_s2] sm:$0xff]  ;;  %v26_v15 = vld [vmem:[%s491_s0 + $0x30] sm:$0xff] }
   0x5   :  { %74 = vmatpush.msra.mxu0 %v28_v5  ;;  %160 = vst [vmem:[#allocation1] ss:$2 sm:$0xff] %v158_v11  ;;  %v20_v12 = vld [vmem:[%s491_s0] sm:$0xff]  ;;  %v21_v16 = vld [vmem:[%s491_s0 + $0x8] sm:$0xff]  ;;  %v27_v17 = vld [vmem:[%s491_s0 + $0x38] sm:$0xff] }
   0x6   :  { %338 = vmatpush.msra.mxu3 %v28_v5  ;;  %303 = vmatmul.msk.f32.vlgmr.msra.gmra.mxu0 %vm34_vm0, %v20_v12  ;;  %v22_v18 = vld [vmem:[%s491_s0 + $0x10] sm:$0xff]  ;;  %v23_v19 = vld [vmem:[%s491_s0 + $0x18] sm:$0xff]  ;;  %v24_v22 = vld [vmem:[%s491_s0 + $0x20] sm:$0xff] }
   0x7   :  { %309 = vmatmul.msk.f32.vlgmr.msra.gmra.mxu3 %vm34_vm0, %v26_v15  ;;  %v25_v26 = vld [vmem:[%s491_s0 + $0x28] sm:$0xff]  ;;  %v346_v42 = vld [vmem:[%s489_s4] ss:$0 sm:$0xff] }
   0xa   :  { %120 = vperm.xlu1 %344, %v103_v6   ;;  %114 = vperm.xlu0 %343, %v101_v7  }
   0xc   :  { %126 = vperm.xlu2 %345, %v105_v8   ;;  %v161_v13 = vld.sshfl [vmem:[#allocation1] sm:$0xff pattern:$0x75316420]  ;;  %v162_v14 = vld.sshfl [vmem:[#allocation1 + $0x8] sm:$0xff pattern:$0x75316420] }
   0xd   :  { %319 = vmatpush.msk.msra.mxu1 %vm188_vm1, %v161_v13  ;;  %339 = vmatpush.msk.msrb.mxu3 %vm188_vm1, %v161_v13 }
   0xe   :  { %328 = vmatpush.msk.msra.mxu2 %vm188_vm1, %v162_v14  ;;  %304 = vmatmul.msk.f32.gmra.mxu0 %vm34_vm0, %v21_v16 }
   0xf   :  { %340 = vmatpush.msk.msra.mxu3 %vm188_vm1, %v162_v14 }
  0x10   :  { %310 = vmatmul.msk.f32.gmra.mxu3 %vm34_vm0, %v27_v17 }
  0x12   :  { %129 = vperm.xlu1 %344, %v106_v9   ;;  %132 = vperm.xlu0 %343, %v107_v10  }
  0x16   :  { %305 = vmatmul.msk.f32.gmra.mxu0 %vm34_vm0, %v22_v18 }
  0x1e   :  { %306 = vmatmul.msk.f32.gmra.mxu0 %vm34_vm0, %v23_v19 }
  0x26   :  { %307 = vmatmul.msk.f32.gmra.mxu0 %vm34_vm0, %v24_v22 }
  0x2e   :  { %308 = vmatmul.msk.f32.gmra.mxu0 %vm34_vm0, %v25_v26 }
  0x5e   :  { %v124_v35 = vpop.permute.xlu2 %123 }
  0x5f   :  { %vm138_vm8 = vcmp.eq.s32.totalorder %v124_v35, %v109_v21 }
  0x60   :  { %v315_v36 = vsel %vm138_vm8, 1.0, %v348_v24 }
  0x66   :  { %v127_v37 = vpop.permute.xlu2 %126 }
  0x67   :  { %vm139_vm9 = vcmp.eq.s32.totalorder %v127_v37, %v109_v21 }
  0x68   :  { %v316_v38 = vsel %vm139_vm9, 1.0, %v348_v24 }
  0x74   :  { %v112_v23 = vpop.permute.xlu0 %111  ;;  %v118_v29 = vpop.permute.xlu1 %117 }
  0x75   :  { %vm134_vm3 = vcmp.eq.s32.totalorder %v112_v23, %v109_v21  ;;  %vm136_vm5 = vcmp.eq.s32.totalorder %v118_v29, %v109_v21 }
  0x76   :  { %v311_v25 = vsel %vm134_vm3, 1.0, %v348_v24  ;;  %v313_v30 = vsel %vm136_vm5, 1.0, %v348_v24 }
  0x77   :  { %320 = vmatmul.msk.f32.vlgmr.msra.gmra.mxu1 %vm163_vm2, %v311_v25  ;;  %329 = vmatmul.msk.f32.vlgmr.msra.gmra.mxu2 %vm163_vm2, %v311_v25 }
  0x7c   :  { %v115_v27 = vpop.permute.xlu0 %114  ;;  %v121_v33 = vpop.permute.xlu1 %120 }
  0x7d   :  { %vm135_vm4 = vcmp.eq.s32.totalorder %v115_v27, %v109_v21  ;;  %vm137_vm7 = vcmp.eq.s32.totalorder %v121_v33, %v109_v21 }
  0x7e   :  { %v312_v28 = vsel %vm135_vm4, 1.0, %v348_v24  ;;  %v314_v34 = vsel %vm137_vm7, 1.0, %v348_v24 }
  0x7f   :  { %321 = vmatmul.msk.f32.gmra.mxu1 %vm163_vm2, %v312_v28  ;;  %330 = vmatmul.msk.f32.gmra.mxu2 %vm163_vm2, %v312_v28 }
  0x83   :  { %v76_v41 = vpop.f32.mrf.mxu0 }
  0x84   :  { %v133_v31 = vpop.permute.xlu0 %132  ;;  %v130_v39 = vpop.permute.xlu1 %129  ;;  %v77_v45 = vadd.f32 %v346_v42, %v76_v41 }
  0x85   :  { %vm141_vm6 = vcmp.eq.s32.totalorder %v133_v31, %v109_v21  ;;  %vm140_vm10 = vcmp.eq.s32.totalorder %v130_v39, %v109_v21 }
  0x86   :  { %v318_v32 = vsel %vm141_vm6, 1.0, %v348_v24  ;;  %v317_v40 = vsel %vm140_vm10, 1.0, %v348_v24 }
  0x87   :  { %322 = vmatmul.msk.f32.gmra.mxu1 %vm163_vm2, %v313_v30  ;;  %327 = vmatmul.msk.f32.vlgmr.msrb.gmra.mxu3 %vm163_vm2, %v318_v32 }
  0x88   :  { %331 = vmatmul.msk.f32.gmra.mxu2 %vm163_vm2, %v313_v30 }
  0x8a   :  { %v94_v46 = vpop.f32.mrf.mxu3 }
  0x8b   :  { %v79_v43 = vpop.f32.mrf.mxu0  ;;  %v95_v22 = vadd.f32 %v346_v42, %v94_v46 }
  0x8c   :  { %v80_v51 = vadd.f32 %v346_v42, %v79_v43 }
  0x8f   :  { %323 = vmatmul.msk.f32.gmra.mxu1 %vm163_vm2, %v314_v34  ;;  %336 = vmatmul.msk.f32.vlgmr.msra.gmra.mxu3 %vm163_vm2, %v318_v32 }
  0x90   :  { %332 = vmatmul.msk.f32.gmra.mxu2 %vm163_vm2, %v314_v34 }
  0x93   :  { %v82_v52 = vpop.f32.mrf.mxu0  ;;  %v97_v53 = vpop.f32.mrf.mxu3 }
  0x94   :  { %v83_v58 = vadd.f32 %v346_v42, %v82_v52  ;;  %v98_v1 = vadd.f32 %v346_v42, %v97_v53 }
  0x97   :  { %324 = vmatmul.msk.f32.gmra.mxu1 %vm163_vm2, %v315_v36 }
  0x98   :  { %333 = vmatmul.msk.f32.gmra.mxu2 %vm163_vm2, %v315_v36 }
  0x9b   :  { %v85_v59 = vpop.f32.mrf.mxu0 }
  0x9c   :  { %v86_v2 = vadd.f32 %v346_v42, %v85_v59 }
  0x9f   :  { %325 = vmatmul.msk.f32.gmra.mxu1 %vm163_vm2, %v316_v38 }
  0xa0   :  { %334 = vmatmul.msk.f32.gmra.mxu2 %vm163_vm2, %v316_v38 }
  0xa3   :  { %v88_v4 = vpop.f32.mrf.mxu0 }
  0xa4   :  { %v89_v11 = vadd.f32 %v346_v42, %v88_v4 }
  0xa7   :  { %326 = vmatmul.msk.f32.gmra.mxu1 %vm163_vm2, %v317_v40 }
  0xa8   :  { %335 = vmatmul.msk.f32.gmra.mxu2 %vm163_vm2, %v317_v40 }
  0xab   :  { %v91_v13 = vpop.f32.mrf.mxu0 }
  0xac   :  { %v92_v17 = vadd.f32 %v346_v42, %v91_v13 }
  0xf4   :  { %v210_v44 = vpop.f32.mrf.mxu1 }
  0xf5   :  { %v275_v47 = vmul.f32 %v210_v44, %v77_v45 }
  0xfa   :  { %v251_v48 = vpop.f32.mrf.mxu2 }
  0xfb   :  { %v283_v49 = vadd.f32 %v275_v47, %v251_v48 }
  0xfc   :  { %v213_v50 = vpop.f32.mrf.mxu1 }
  0xfd   :  { %291 = vst [vmem:[%s492_s5] sm:$0xff] %v283_v49  ;;  %v276_v54 = vmul.f32 %v213_v50, %v80_v51 }
 0x102   :  { %v254_v55 = vpop.f32.mrf.mxu2 }
 0x103   :  { %v284_v56 = vadd.f32 %v276_v54, %v254_v55 }
 0x104   :  { %v216_v57 = vpop.f32.mrf.mxu1 }
 0x105   :  { %292 = vst [vmem:[%s492_s5 + $0x8] sm:$0xff] %v284_v56  ;;  %v277_v60 = vmul.f32 %v216_v57, %v83_v58 }
 0x10a   :  { %v231_v61 = vpop.f32.mrf.mxu3 }
 0x10b   :  { %v257_v62 = vpop.f32.mrf.mxu2  ;;  %v282_v3 = vmul.f32 %v231_v61, %v98_v1 }
 0x10c   :  { %v285_v63 = vadd.f32 %v277_v60, %v257_v62  ;;  %v219_v0 = vpop.f32.mrf.mxu1 }
 0x10d   :  { %v278_v5 = vmul.f32 %v219_v0, %v86_v2 }
 0x10e   :  { %293 = vst [vmem:[%s492_s5 + $0x10] sm:$0xff] %v285_v63 }
 0x112   :  { %v272_v6 = vpop.f32.mrf.mxu3 }
 0x113   :  { %v260_v7 = vpop.f32.mrf.mxu2  ;;  %v290_v8 = vadd.f32 %v282_v3, %v272_v6 }
 0x114   :  { %v286_v9 = vadd.f32 %v278_v5, %v260_v7  ;;  %v222_v10 = vpop.f32.mrf.mxu1 }
 0x115   :  { %298 = vst [vmem:[%s492_s5 + $0x38] sm:$0xff] %v290_v8  ;;  %v279_v12 = vmul.f32 %v222_v10, %v89_v11 }
 0x116   :  { %294 = vst [vmem:[%s492_s5 + $0x18] sm:$0xff] %v286_v9 }
 0x11b   :  { %v263_v14 = vpop.f32.mrf.mxu2 }
 0x11c   :  { %v287_v15 = vadd.f32 %v279_v12, %v263_v14  ;;  %v225_v16 = vpop.f32.mrf.mxu1 }
 0x11d   :  { %v280_v18 = vmul.f32 %v225_v16, %v92_v17 }
 0x11e   :  { %295 = vst [vmem:[%s492_s5 + $0x20] sm:$0xff] %v287_v15 }
 0x123   :  { %v266_v19 = vpop.f32.mrf.mxu2 }
 0x124   :  { %v288_v20 = vadd.f32 %v280_v18, %v266_v19  ;;  %v228_v21 = vpop.f32.mrf.mxu1 }
 0x125   :  { %v281_v23 = vmul.f32 %v228_v21, %v95_v22 }
 0x126   :  { %296 = vst [vmem:[%s492_s5 + $0x28] sm:$0xff] %v288_v20 }
 0x12b   :  { %v269_v24 = vpop.f32.mrf.mxu2 }
 0x12c   :  { %v289_v25 = vadd.f32 %v281_v23, %v269_v24 }
 0x12e   :  { %297 = vst [vmem:[%s492_s5 + $0x30] sm:$0xff] %v289_v25 }

</bundles_post_ra>
